<compile_context>
chip_gen: v6e
topology: v6e:2x2x1
jax: 0.10.0
libtpu: 0.0.40
codegen_flags: <defaults>
</compile_context>

<pallas_src>
import functools

import jax
import jax.numpy as jnp
from jax import lax
from jax.experimental import pallas as pl
from jax.experimental.pallas import tpu as pltpu


_SMALL_VOCAB_MAX = 2048        # counts@table fast path only below this vocab size


def _round_up(x, m):
    return (x + m - 1) // m * m


def _chip_config():
    """(per-core VMEM bytes, TensorCores per chip, preferred MXU row tile)."""
    kind = ""
    try:
        kind = jax.devices()[0].device_kind.lower()
    except Exception:
        pass
    is_v7 = "v7" in kind
    small_mxu = any(t in kind for t in ("v2", "v3", "v4", "v5"))
    vmem_phys = (64 << 20) if is_v7 else (128 << 20)        # per-TensorCore
    try:  # prefer the real number when the query is available
        info = pltpu.get_tpu_info()
        vmem_phys = min(int(getattr(info, "vmem_capacity_bytes", vmem_phys)),
                        vmem_phys)
    except Exception:
        pass
    num_tc = 2 if is_v7 else 1
    mxu_rows = 128 if small_mxu else 256                    # v5e 4x128^2, v6e/v7x 2x256^2
    return vmem_phys, num_tc, mxu_rows


def _pick_batch_tile(B, mxu_rows, num_tc):
    tb = min(mxu_rows, _round_up(B, 8))
    if num_tc > 1:
        # Guarantee >= num_tc grid steps so both v7x TensorCores get work.
        per_core = _round_up(-(-B // num_tc), 8)
        tb = min(tb, max(per_core, 8))
    return max(tb, 8)


def _vmem_limit(bytes_needed, vmem_phys):
    cap = int(vmem_phys * 0.8)        # headroom for Mosaic internal scratch
    return int(min(max(bytes_needed, 32 << 20), cap))


@functools.lru_cache(maxsize=None)
def _single_buffer_ok():
    """Probe pipeline_mode=pl.Buffered(1) support (single-buffer grid-invariant inputs)."""
    def _copy(x_ref, o_ref):
        o_ref[...] = x_ref[...]
    try:
        fn = pl.pallas_call(
            _copy,
            out_shape=jax.ShapeDtypeStruct((16, 128), jnp.float32),
            grid=(2,),
            in_specs=[pl.BlockSpec((8, 128), lambda i: (0, 0),
                                   pipeline_mode=pl.Buffered(buffer_count=1))],
            out_specs=pl.BlockSpec((8, 128), lambda i: (i, 0)),
        )
        jax.block_until_ready(fn(jnp.zeros((8, 128), jnp.float32)))
        return True
    except Exception:
        return False


def _invariant_spec(block_shape, index_map, single_buffer):
    """BlockSpec for a grid-invariant input: single-buffered when supported."""
    if single_buffer:
        return pl.BlockSpec(block_shape, index_map,
                            pipeline_mode=pl.Buffered(buffer_count=1))
    return pl.BlockSpec(block_shape, index_map)


# ---------------------------------------------------------------------------
# Fast path (small vocab): one-hot counts matmul fuses gather + mean-pool.
# ---------------------------------------------------------------------------
def _small_vocab_kernel(ids_ref, table_ref, w_ref, b_ref, out_ref):
    """ids [TB,S] i32 | table [Vp,D] | w [D,H] | b [1,H] f32 -> out [TB,H] f32."""
    TB, S = ids_ref.shape
    Vp = table_ref.shape[0]

    ids = ids_ref[...]                                          # (TB, S) int32
    s_iota = lax.broadcasted_iota(jnp.int32, (TB, S), 1)
    vocab = lax.broadcasted_iota(jnp.int32, (TB, Vp), 1)

    # counts[b, v] = #{s : ids[b, s] == v}.  Column s is extracted with a
    # select-and-lane-reduce (no dynamic lane slice), compares/adds stay in f32
    # (v5e has no bf16 VALU), and the bool->f32 cast is folded into the add.
    # Out-of-range / vocab-pad rows match nothing and contribute zero.
    def body(s, counts):
        col = jnp.sum(jnp.where(s_iota == s, ids, 0), axis=1, keepdims=True)  # (TB,1)
        return counts + (vocab == col).astype(jnp.float32)

    counts = lax.fori_loop(0, S, body, jnp.zeros((TB, Vp), jnp.float32),
                           unroll=True)

    # Gather + mean-pool fused into one MXU matmul; cast to the table dtype only
    # here (exact for counts <= S <= 256 even in bf16).
    pooled = jnp.dot(counts.astype(table_ref.dtype), table_ref[...],
                     preferred_element_type=jnp.float32) * (1.0 / S)

    h = jnp.dot(pooled.astype(w_ref.dtype), w_ref[...],
                preferred_element_type=jnp.float32)
    h = h + b_ref[...].astype(jnp.float32)
    out_ref[...] = jnp.tanh(h).astype(out_ref.dtype)


# ---------------------------------------------------------------------------
# Gather path (large vocab): table stays in HBM, per-tile row DMAs.
# ---------------------------------------------------------------------------
def _gather_kernel(ids_ref, table_ref, w_ref, b_ref, out_ref, emb_ref, sem):
    """ids (SMEM, flat [Bp*S]) | table (HBM [V,D]) | w [D,H] | b [1,H] -> out [TB,H]."""
    i = pl.program_id(0)
    TB, S, D = emb_ref.shape
    V = table_ref.shape[0]
    base = i * TB * S

    # One row-DMA per (row, token).  All copies have identical size and share a
    # single semaphore, so the drain loop simply waits TB*S times.
    @pl.loop(0, TB * S)
    def _issue(t):
        tok = jnp.clip(ids_ref[base + t], 0, V - 1)     # clamp: no OOB HBM DMA
        r = t // S
        s = t - r * S
        pltpu.make_async_copy(table_ref.at[pl.ds(tok, 1)],      # (1, D) HBM row
                              emb_ref.at[r, pl.ds(s, 1)],       # (1, D) VMEM row
                              sem.at[0]).start()

    @pl.loop(0, TB * S)
    def _drain(t):
        pltpu.make_async_copy(table_ref.at[pl.ds(0, 1)],
                              emb_ref.at[0, pl.ds(0, 1)],
                              sem.at[0]).wait()

    pooled = jnp.sum(emb_ref[...].astype(jnp.float32), axis=1) * (1.0 / S)
    h = jnp.dot(pooled.astype(w_ref.dtype), w_ref[...],
                preferred_element_type=jnp.float32)
    h = h + b_ref[...].astype(jnp.float32)
    out_ref[...] = jnp.tanh(h).astype(out_ref.dtype)


# ---------------------------------------------------------------------------
# Wrappers
# ---------------------------------------------------------------------------
def encode(ids, table, w, b):
    """ids [B,S] int32 -> [B,H] f32 (embedding lookup -> mean-pool -> Linear -> tanh)."""
    return _encode_jit(ids, table, w, b, _single_buffer_ok())


@functools.partial(jax.jit, static_argnums=(4,))
def _encode_jit(ids, table, w, b, single_buffer):
    B, S = ids.shape
    V, D = table.shape
    H = w.shape[1]

    vmem_phys, num_tc, mxu_rows = _chip_config()
    TB = _pick_batch_tile(B, mxu_rows, num_tc)
    Bp = _round_up(B, TB)
    if Bp != B:
        ids = jnp.pad(ids, ((0, Bp - B), (0, 0)))       # pad rows with padding_idx=0

    b2 = b.reshape(1, H).astype(jnp.float32)

    def _bytes(a):
        return a.size * a.dtype.itemsize

    inv_bufs = 1 if single_buffer else 2

    if V <= _SMALL_VOCAB_MAX:
        # ---- fast path: resident, lane-dense table + one-hot counts matmul ----
        assert S <= 256 or table.dtype.itemsize >= 4, \
            "bf16 counts are exact only for S <= 256"
        Vp = _round_up(V, 128)
        if Vp != V:
            table = jnp.pad(table, ((0, Vp - V), (0, 0)))
        vmem_bytes = (inv_bufs * (_bytes(table) + _bytes(w) + _bytes(b2))
                      + 2 * (TB * S * 4 + TB * H * 4)           # pipelined ids / out
                      + TB * Vp * 4                             # counts intermediate
                      + (2 << 20))
        cost = pl.CostEstimate(
            flops=2 * Bp * Vp * D + 2 * Bp * D * H,
            transcendentals=Bp * H,
            bytes_accessed=_bytes(table) + _bytes(w) + _bytes(b2)
            + Bp * S * 4 + Bp * H * 4)
        out = pl.pallas_call(
            _small_vocab_kernel,
            out_shape=jax.ShapeDtypeStruct((Bp, H), jnp.float32),
            grid_spec=pltpu.PrefetchScalarGridSpec(
                num_scalar_prefetch=0,
                grid=(Bp // TB,),
                in_specs=[
                    pl.BlockSpec((TB, S), lambda i: (i, 0)),
                    _invariant_spec((Vp, D), lambda i: (0, 0), single_buffer),
                    _invariant_spec((D, H), lambda i: (0, 0), single_buffer),
                    _invariant_spec((1, H), lambda i: (0, 0), single_buffer),
                ],
                out_specs=pl.BlockSpec((TB, H), lambda i: (i, 0)),
            ),
            compiler_params=pltpu.CompilerParams(
                dimension_semantics=("parallel",),
                vmem_limit_bytes=_vmem_limit(vmem_bytes, vmem_phys),
            ),
            cost_estimate=cost,
        )(ids, table, w, b2)
    else:
        # ---- gather path: table stays in HBM, ids scalar-prefetched to SMEM ----
        ids_flat = ids.reshape(Bp * S)
        Dp = _round_up(D, 128)
        vmem_bytes = (inv_bufs * (_bytes(w) + _bytes(b2))
                      + TB * S * Dp * table.dtype.itemsize      # gathered-rows scratch
                      + 2 * TB * H * 4 + TB * Dp * 4
                      + (2 << 20))
        cost = pl.CostEstimate(
            flops=2 * Bp * D * H,
            transcendentals=Bp * H,
            bytes_accessed=Bp * S * D * table.dtype.itemsize
            + _bytes(w) + _bytes(b2) + Bp * S * 4 + Bp * H * 4)
        out = pl.pallas_call(
            _gather_kernel,
            out_shape=jax.ShapeDtypeStruct((Bp, H), jnp.float32),
            grid_spec=pltpu.PrefetchScalarGridSpec(
                num_scalar_prefetch=1,                          # ids -> SMEM
                grid=(Bp // TB,),
                in_specs=[
                    pl.BlockSpec(memory_space=pl.ANY),          # table stays in HBM
                    _invariant_spec((D, H), lambda i, ids: (0, 0), single_buffer),
                    _invariant_spec((1, H), lambda i, ids: (0, 0), single_buffer),
                ],
                out_specs=pl.BlockSpec((TB, H), lambda i, ids: (i, 0)),
                scratch_shapes=[
                    pltpu.VMEM((TB, S, D), table.dtype),
                    pltpu.SemaphoreType.DMA((1,)),
                ],
            ),
            compiler_params=pltpu.CompilerParams(
                dimension_semantics=("parallel",),
                vmem_limit_bytes=_vmem_limit(vmem_bytes, vmem_phys),
            ),
            cost_estimate=cost,
        )(ids_flat, table, w, b2)
    return out[:B]


def similarity_template_forward(params, query, candidate,
                                negative_candidate_for_triplet=None):
    """Mirror of SimilarityTemplate.forward: returns the list of encoded inputs.

    Shared embedding layer and shared query/candidate model (module defaults:
    candidate_model=None, embedding_layer_same=True), so all heads are fused
    into one kernel launch (table staged once, larger batch tile).
    Assumes all heads share the same sequence length S.
    """
    table, w, b = params["embedding"], params["w"], params["b"]
    inputs = [query, candidate]
    if negative_candidate_for_triplet is not None:
        inputs.append(negative_candidate_for_triplet)
    n = len(inputs)
    B = inputs[0].shape[0]
    stacked = jnp.concatenate(inputs, axis=0)       # [n*B, S]
    enc = encode(stacked, table, w, b)
    return [enc[i * B:(i + 1) * B] for i in range(n)]


def _reference_encode(ids, table, w, b):
    emb = table[ids]                  # [B, S, D]
    pooled = emb.mean(axis=1)         # [B, D]  (divides by full S, incl. padding,
    return jnp.tanh(pooled @ w + b)   #  matching the kernel / module semantics)


if __name__ == "__main__":
    # Small, deterministic setup (fast path: V=64 <= 2048).
    B, S = 2, 8                 # batch, sequence
    V, D, H = 64, 128, 128      # vocab, embedding dim, encoder output dim

    key = jax.random.PRNGKey(0)
    k_emb, k_w, k_b, k_q, k_c, k_n, k_big = jax.random.split(key, 7)

    embedding = jax.random.normal(k_emb, (V, D), jnp.float32) * 0.02
    embedding = embedding.at[0].set(0.0)            # padding_idx = 0
    w = jax.random.normal(k_w, (D, H), jnp.float32) * 0.05
    b = jax.random.normal(k_b, (H,), jnp.float32) * 0.01
    params = {"embedding": embedding, "w": w, "b": b}

    query = jax.random.randint(k_q, (B, S), 0, V, jnp.int32)
    candidate = jax.random.randint(k_c, (B, S), 0, V, jnp.int32)
    negative = jax.random.randint(k_n, (B, S), 0, V, jnp.int32)

    # Cross-entropy style call (2 heads) and triplet style call (3 heads).
    outs = similarity_template_forward(params, query, candidate)
    outs3 = similarity_template_forward(params, query, candidate, negative)
    outs = [jax.block_until_ready(o) for o in outs]
    outs3 = [jax.block_until_ready(o) for o in outs3]

    ref_q = _reference_encode(query, embedding, w, b)
    ref_c = _reference_encode(candidate, embedding, w, b)
    ref_n = _reference_encode(negative, embedding, w, b)
    assert all(o.shape == (B, H) for o in outs + outs3)
    assert jnp.allclose(outs[0], ref_q, atol=1e-5)
    assert jnp.allclose(outs[1], ref_c, atol=1e-5)
    assert jnp.allclose(outs3[0], ref_q, atol=1e-5)
    assert jnp.allclose(outs3[1], ref_c, atol=1e-5)
    assert jnp.allclose(outs3[2], ref_n, atol=1e-5)

    # bf16 table / weights (halves DMA traffic; f32 accumulation inside).
    out_bf16 = jax.block_until_ready(
        encode(query, embedding.astype(jnp.bfloat16), w.astype(jnp.bfloat16), b))
    assert jnp.allclose(out_bf16, ref_q, atol=5e-3)

    # Large-vocab gather path (table stays in HBM, per-row DMAs).
    V_big = 4096
    big_table = jax.random.normal(k_big, (V_big, D), jnp.float32) * 0.02
    big_table = big_table.at[0].set(0.0)
    query_big = jax.random.randint(k_q, (B, S), 0, V_big, jnp.int32)
    out_big = jax.block_until_ready(encode(query_big, big_table, w, b))
    ref_big = _reference_encode(query_big, big_table, w, b)
    assert jnp.allclose(out_big, ref_big, atol=1e-5)

    # TODO(synk): BCELoss / TripletMarginLoss / CosineSimilarity recall are
    # host-side training utilities, not part of forward; not kernelized.
    # TODO(synk): very long sequences in the gather path should chunk S (and the
    # row DMAs) to bound the (TB,S,D) VMEM scratch.
    print("KERNEL_OK")
</pallas_src>

<mosaic_0001>
module attributes {stable_mosaic.version = 11 : i64} {
  func.func @_copy(%arg0: i32, %arg1: memref<8x128xf32, #tpu.memory_space<vmem>>, %arg2: memref<8x128xf32, #tpu.memory_space<vmem>>) attributes {dimension_semantics = [#tpu.dimension_semantics<arbitrary>], iteration_bounds = array<i64: 2>, scalar_prefetch = 0 : i64, scratch_operands = 0 : i64, tpu.core_type = #tpu.core_type<tc>, window_params = [{pipeline_mode = #tpu.pipeline_mode<synchronous>, transform_indices = @transform_0, window_bounds = array<i64: 8, 128>}, {transform_indices = @transform_1, window_bounds = array<i64: 8, 128>}]} {
    %c0 = arith.constant 0 : index
    %c0_0 = arith.constant 0 : index
    %0 = vector.load %arg1[%c0, %c0_0] : memref<8x128xf32, #tpu.memory_space<vmem>>, vector<8x128xf32>
    %c0_1 = arith.constant 0 : index
    %c0_2 = arith.constant 0 : index
    %1 = vector.load %arg2[%c0_1, %c0_2] : memref<8x128xf32, #tpu.memory_space<vmem>>, vector<8x128xf32>
    tpu.vector_store %arg2[%c0_1, %c0_2], %0 {strides = array<i32>} : memref<8x128xf32, #tpu.memory_space<vmem>>, vector<8x128xf32>,
    return
  }
  func.func @transform_0(%arg0: i32) -> (i32, i32) {
    %c0_i32 = arith.constant 0 : i32
    %c0_i32_0 = arith.constant 0 : i32
    %c0_i32_1 = arith.constant 0 : i32
    return %c0_i32, %c0_i32_0 : i32, i32
  }
  func.func @transform_1(%arg0: i32) -> (i32, i32) {
    %c0_i32 = arith.constant 0 : i32
    %c0_i32_0 = arith.constant 0 : i32
    return %arg0, %c0_i32 : i32, i32
  }
}

module attributes {stable_mosaic.version = 11 : i64} {
  func.func @_small_vocab_kernel(%arg0: i32, %arg1: memref<8x8xi32, #tpu.memory_space<vmem>>, %arg2: memref<128x128xf32, #tpu.memory_space<vmem>>, %arg3: memref<128x128xf32, #tpu.memory_space<vmem>>, %arg4: memref<1x128xf32, #tpu.memory_space<vmem>>, %arg5: memref<8x128xf32, #tpu.memory_space<vmem>>) attributes {dimension_semantics = [#tpu.dimension_semantics<parallel>], iteration_bounds = array<i64: 1>, scalar_prefetch = 0 : i64, scratch_operands = 0 : i64, tpu.core_type = #tpu.core_type<tc>, window_params = [{transform_indices = @transform_0, window_bounds = array<i64: 8, 8>}, {pipeline_mode = #tpu.pipeline_mode<synchronous>, transform_indices = @transform_1, window_bounds = array<i64: 128, 128>}, {pipeline_mode = #tpu.pipeline_mode<synchronous>, transform_indices = @transform_2, window_bounds = array<i64: 128, 128>}, {pipeline_mode = #tpu.pipeline_mode<synchronous>, transform_indices = @transform_3, window_bounds = array<i64: 1, 128>}, {transform_indices = @transform_4, window_bounds = array<i64: 8, 128>}]} {
    %c0 = arith.constant 0 : index
    %c0_0 = arith.constant 0 : index
    %0 = vector.load %arg1[%c0, %c0_0] : memref<8x8xi32, #tpu.memory_space<vmem>>, vector<8x8xi32>
    %1 = tpu.iota {dimensions = array<i32: 1>} : vector<8x8xi32>
    %2 = tpu.iota {dimensions = array<i32: 1>} : vector<8x128xi32>
    %cst = arith.constant 0.000000e+00 : f32
    %3 = vector.broadcast %cst : f32 to vector<8x128xf32>
    %c0_i32 = arith.constant 0 : i32
    %4 = vector.broadcast %c0_i32 : i32 to vector<8x8xi32>
    %5 = arith.cmpi eq, %1, %4 : vector<8x8xi32>
    %c0_i32_1 = arith.constant 0 : i32
    %6 = vector.broadcast %c0_i32_1 : i32 to vector<8x8xi32>
    %7 = arith.select %5, %0, %6 : vector<8x8xi1>, vector<8x8xi32>
    %cst_2 = arith.constant dense<0> : vector<8xi32>
    %8 = vector.multi_reduction <add>, %7, %cst_2 [1] : vector<8x8xi32> to vector<8xi32>
    %9 = vector.shape_cast %8 : vector<8xi32> to vector<8x1xi32>
    %10 = vector.broadcast %9 : vector<8x1xi32> to vector<8x128xi32>
    %11 = arith.cmpi eq, %2, %10 : vector<8x128xi32>
    %12 = arith.extui %11 : vector<8x128xi1> to vector<8x128xi32>
    %13 = arith.sitofp %12 : vector<8x128xi32> to vector<8x128xf32>
    %14 = arith.addf %3, %13 : vector<8x128xf32>
    %c1_i32 = arith.constant 1 : i32
    %15 = vector.broadcast %c1_i32 : i32 to vector<8x8xi32>
    %16 = arith.cmpi eq, %1, %15 : vector<8x8xi32>
    %c0_i32_3 = arith.constant 0 : i32
    %17 = vector.broadcast %c0_i32_3 : i32 to vector<8x8xi32>
    %18 = arith.select %16, %0, %17 : vector<8x8xi1>, vector<8x8xi32>
    %cst_4 = arith.constant dense<0> : vector<8xi32>
    %19 = vector.multi_reduction <add>, %18, %cst_4 [1] : vector<8x8xi32> to vector<8xi32>
    %20 = vector.shape_cast %19 : vector<8xi32> to vector<8x1xi32>
    %21 = vector.broadcast %20 : vector<8x1xi32> to vector<8x128xi32>
    %22 = arith.cmpi eq, %2, %21 : vector<8x128xi32>
    %23 = arith.extui %22 : vector<8x128xi1> to vector<8x128xi32>
    %24 = arith.sitofp %23 : vector<8x128xi32> to vector<8x128xf32>
    %25 = arith.addf %14, %24 : vector<8x128xf32>
    %c2_i32 = arith.constant 2 : i32
    %26 = vector.broadcast %c2_i32 : i32 to vector<8x8xi32>
    %27 = arith.cmpi eq, %1, %26 : vector<8x8xi32>
    %c0_i32_5 = arith.constant 0 : i32
    %28 = vector.broadcast %c0_i32_5 : i32 to vector<8x8xi32>
    %29 = arith.select %27, %0, %28 : vector<8x8xi1>, vector<8x8xi32>
    %cst_6 = arith.constant dense<0> : vector<8xi32>
    %30 = vector.multi_reduction <add>, %29, %cst_6 [1] : vector<8x8xi32> to vector<8xi32>
    %31 = vector.shape_cast %30 : vector<8xi32> to vector<8x1xi32>
    %32 = vector.broadcast %31 : vector<8x1xi32> to vector<8x128xi32>
    %33 = arith.cmpi eq, %2, %32 : vector<8x128xi32>
    %34 = arith.extui %33 : vector<8x128xi1> to vector<8x128xi32>
    %35 = arith.sitofp %34 : vector<8x128xi32> to vector<8x128xf32>
    %36 = arith.addf %25, %35 : vector<8x128xf32>
    %c3_i32 = arith.constant 3 : i32
    %37 = vector.broadcast %c3_i32 : i32 to vector<8x8xi32>
    %38 = arith.cmpi eq, %1, %37 : vector<8x8xi32>
    %c0_i32_7 = arith.constant 0 : i32
    %39 = vector.broadcast %c0_i32_7 : i32 to vector<8x8xi32>
    %40 = arith.select %38, %0, %39 : vector<8x8xi1>, vector<8x8xi32>
    %cst_8 = arith.constant dense<0> : vector<8xi32>
    %41 = vector.multi_reduction <add>, %40, %cst_8 [1] : vector<8x8xi32> to vector<8xi32>
    %42 = vector.shape_cast %41 : vector<8xi32> to vector<8x1xi32>
    %43 = vector.broadcast %42 : vector<8x1xi32> to vector<8x128xi32>
    %44 = arith.cmpi eq, %2, %43 : vector<8x128xi32>
    %45 = arith.extui %44 : vector<8x128xi1> to vector<8x128xi32>
    %46 = arith.sitofp %45 : vector<8x128xi32> to vector<8x128xf32>
    %47 = arith.addf %36, %46 : vector<8x128xf32>
    %c4_i32 = arith.constant 4 : i32
    %48 = vector.broadcast %c4_i32 : i32 to vector<8x8xi32>
    %49 = arith.cmpi eq, %1, %48 : vector<8x8xi32>
    %c0_i32_9 = arith.constant 0 : i32
    %50 = vector.broadcast %c0_i32_9 : i32 to vector<8x8xi32>
    %51 = arith.select %49, %0, %50 : vector<8x8xi1>, vector<8x8xi32>
    %cst_10 = arith.constant dense<0> : vector<8xi32>
    %52 = vector.multi_reduction <add>, %51, %cst_10 [1] : vector<8x8xi32> to vector<8xi32>
    %53 = vector.shape_cast %52 : vector<8xi32> to vector<8x1xi32>
    %54 = vector.broadcast %53 : vector<8x1xi32> to vector<8x128xi32>
    %55 = arith.cmpi eq, %2, %54 : vector<8x128xi32>
    %56 = arith.extui %55 : vector<8x128xi1> to vector<8x128xi32>
    %57 = arith.sitofp %56 : vector<8x128xi32> to vector<8x128xf32>
    %58 = arith.addf %47, %57 : vector<8x128xf32>
    %c5_i32 = arith.constant 5 : i32
    %59 = vector.broadcast %c5_i32 : i32 to vector<8x8xi32>
    %60 = arith.cmpi eq, %1, %59 : vector<8x8xi32>
    %c0_i32_11 = arith.constant 0 : i32
    %61 = vector.broadcast %c0_i32_11 : i32 to vector<8x8xi32>
    %62 = arith.select %60, %0, %61 : vector<8x8xi1>, vector<8x8xi32>
    %cst_12 = arith.constant dense<0> : vector<8xi32>
    %63 = vector.multi_reduction <add>, %62, %cst_12 [1] : vector<8x8xi32> to vector<8xi32>
    %64 = vector.shape_cast %63 : vector<8xi32> to vector<8x1xi32>
    %65 = vector.broadcast %64 : vector<8x1xi32> to vector<8x128xi32>
    %66 = arith.cmpi eq, %2, %65 : vector<8x128xi32>
    %67 = arith.extui %66 : vector<8x128xi1> to vector<8x128xi32>
    %68 = arith.sitofp %67 : vector<8x128xi32> to vector<8x128xf32>
    %69 = arith.addf %58, %68 : vector<8x128xf32>
    %c6_i32 = arith.constant 6 : i32
    %70 = vector.broadcast %c6_i32 : i32 to vector<8x8xi32>
    %71 = arith.cmpi eq, %1, %70 : vector<8x8xi32>
    %c0_i32_13 = arith.constant 0 : i32
    %72 = vector.broadcast %c0_i32_13 : i32 to vector<8x8xi32>
    %73 = arith.select %71, %0, %72 : vector<8x8xi1>, vector<8x8xi32>
    %cst_14 = arith.constant dense<0> : vector<8xi32>
    %74 = vector.multi_reduction <add>, %73, %cst_14 [1] : vector<8x8xi32> to vector<8xi32>
    %75 = vector.shape_cast %74 : vector<8xi32> to vector<8x1xi32>
    %76 = vector.broadcast %75 : vector<8x1xi32> to vector<8x128xi32>
    %77 = arith.cmpi eq, %2, %76 : vector<8x128xi32>
    %78 = arith.extui %77 : vector<8x128xi1> to vector<8x128xi32>
    %79 = arith.sitofp %78 : vector<8x128xi32> to vector<8x128xf32>
    %80 = arith.addf %69, %79 : vector<8x128xf32>
    %c7_i32 = arith.constant 7 : i32
    %81 = vector.broadcast %c7_i32 : i32 to vector<8x8xi32>
    %82 = arith.cmpi eq, %1, %81 : vector<8x8xi32>
    %c0_i32_15 = arith.constant 0 : i32
    %83 = vector.broadcast %c0_i32_15 : i32 to vector<8x8xi32>
    %84 = arith.select %82, %0, %83 : vector<8x8xi1>, vector<8x8xi32>
    %cst_16 = arith.constant dense<0> : vector<8xi32>
    %85 = vector.multi_reduction <add>, %84, %cst_16 [1] : vector<8x8xi32> to vector<8xi32>
    %86 = vector.shape_cast %85 : vector<8xi32> to vector<8x1xi32>
    %87 = vector.broadcast %86 : vector<8x1xi32> to vector<8x128xi32>
    %88 = arith.cmpi eq, %2, %87 : vector<8x128xi32>
    %89 = arith.extui %88 : vector<8x128xi1> to vector<8x128xi32>
    %90 = arith.sitofp %89 : vector<8x128xi32> to vector<8x128xf32>
    %91 = arith.addf %80, %90 : vector<8x128xf32>
    %c8_i32 = arith.constant 8 : i32
    %c0_17 = arith.constant 0 : index
    %c0_18 = arith.constant 0 : index
    %92 = vector.load %arg2[%c0_17, %c0_18] : memref<128x128xf32, #tpu.memory_space<vmem>>, vector<128x128xf32>
    %cst_19 = arith.constant dense<0.000000e+00> : vector<8x128xf32>
    %93 = tpu.matmul %91, %92, %cst_19 {dimension_numbers = #tpu.dot_dimension_numbers<[1], [0], [0], [1], [0, 0, 1, 1], [], []>} : vector<8x128xf32>, vector<128x128xf32>, vector<8x128xf32> -> vector<8x128xf32>
    %cst_20 = arith.constant 1.250000e-01 : f32
    %94 = vector.broadcast %cst_20 : f32 to vector<8x128xf32>
    %95 = arith.mulf %93, %94 : vector<8x128xf32>
    %c0_21 = arith.constant 0 : index
    %c0_22 = arith.constant 0 : index
    %96 = vector.load %arg3[%c0_21, %c0_22] : memref<128x128xf32, #tpu.memory_space<vmem>>, vector<128x128xf32>
    %cst_23 = arith.constant dense<0.000000e+00> : vector<8x128xf32>
    %97 = tpu.matmul %95, %96, %cst_23 {dimension_numbers = #tpu.dot_dimension_numbers<[1], [0], [0], [1], [0, 0, 1, 1], [], []>} : vector<8x128xf32>, vector<128x128xf32>, vector<8x128xf32> -> vector<8x128xf32>
    %c0_24 = arith.constant 0 : index
    %c0_25 = arith.constant 0 : index
    %98 = vector.load %arg4[%c0_24, %c0_25] : memref<1x128xf32, #tpu.memory_space<vmem>>, vector<1x128xf32>
    %99 = vector.broadcast %98 : vector<1x128xf32> to vector<8x128xf32>
    %100 = arith.addf %97, %99 : vector<8x128xf32>
    %101 = math.tanh %100 : vector<8x128xf32>
    %c0_26 = arith.constant 0 : index
    %c0_27 = arith.constant 0 : index
    %102 = vector.load %arg5[%c0_26, %c0_27] : memref<8x128xf32, #tpu.memory_space<vmem>>, vector<8x128xf32>
    tpu.vector_store %arg5[%c0_26, %c0_27], %101 {strides = array<i32>} : memref<8x128xf32, #tpu.memory_space<vmem>>, vector<8x128xf32>,
    return
  }
  func.func @transform_0(%arg0: i32) -> (i32, i32) {
    %c0_i32 = arith.constant 0 : i32
    %c0_i32_0 = arith.constant 0 : i32
    return %arg0, %c0_i32 : i32, i32
  }
  func.func @transform_1(%arg0: i32) -> (i32, i32) {
    %c0_i32 = arith.constant 0 : i32
    %c0_i32_0 = arith.constant 0 : i32
    %c0_i32_1 = arith.constant 0 : i32
    return %c0_i32, %c0_i32_0 : i32, i32
  }
  func.func @transform_2(%arg0: i32) -> (i32, i32) {
    %c0_i32 = arith.constant 0 : i32
    %c0_i32_0 = arith.constant 0 : i32
    %c0_i32_1 = arith.constant 0 : i32
    return %c0_i32, %c0_i32_0 : i32, i32
  }
  func.func @transform_3(%arg0: i32) -> (i32, i32) {
    %c0_i32 = arith.constant 0 : i32
    %c0_i32_0 = arith.constant 0 : i32
    %c0_i32_1 = arith.constant 0 : i32
    return %c0_i32, %c0_i32_0 : i32, i32
  }
  func.func @transform_4(%arg0: i32) -> (i32, i32) {
    %c0_i32 = arith.constant 0 : i32
    %c0_i32_0 = arith.constant 0 : i32
    return %arg0, %c0_i32 : i32, i32
  }
}

</mosaic_0001>

<bundles_post_ra>
// kernel: tpu_custom_call.1
= control target key start
LH: loop header
LB: loop body
LE: loop exit
PB: predicated region body
PF: predicated region fallthrough
CT: control target
= control target key end

     0   :  { %6 = vsyncpa [#allocation3], 0  ;;  %s453_s0 = inlined_call_operand.hbm [shape: f32[8,128], index: 0, kind: input, shape index: {}]   ;;  %s454_s1 = inlined_call_operand.hbm [shape: f32[16,128], index: 1, kind: output, shape index: {}]  }
   0x1   :  { %7 = vsyncpa [#allocation4], 0 }
   0x2   :  { %9 = vsyncpa [#allocation4 + $0x1], 0  ;;  %s347_s6 = smov 0   ;;  %s349_s7 = smov 0  }
   0x3   :  { %s351_s8 = smov 0   ;;  %s353_s9 = smov 0  }
   0x4 LB: > { %s368_s10 = sadd.s32 4294967295, %s333_s9   ;;  %s183_s11 = sadd.s32 4294967294, %s333_s9   ;;  %s333_s9 = sphi %s353_s9, %s462_s9   ;;  %s329_s8 = sphi %s351_s8, %s461_s8   ;;  %s325_s7 = sphi %s349_s7, %s460_s7   ;;  %s321_s6 = sphi %s347_s6, %s459_s6  }
   0x5   : > { %s372_s12 = sadd.s32 1, %s333_s9   ;;  %s43_s13 = sadd.s32 1, %s329_s8 }
   0x6   : > { %s40_s14 = ssub.s32 %s333_s9, %s372_s12  ;;  %p53_p0 = scmp.ne.s32.totalorder %s329_s8, %s325_s7 }
   0x7   : > { %p41_p1 = scmp.eq.s32.totalorder %s40_s14, 0  ;;  %p54_p2 = scmp.eq.s32.totalorder %s368_s10, 1 }
   0x8   : > { %p59_p3 = scmp.ne.s32.totalorder %s325_s7, %s321_s6  ;;  %p60_p4 = scmp.eq.s32.totalorder %s183_s11, 1 }
   0x9   : > { %s383_s15 = scalar_select %p41_p1, %s329_s8, %s43_s13  }
   0xa   : > { %p385_p5 = por %p54_p2, %p53_p0  ;;  %p389_p6 = por %p60_p4, %p59_p3 }
   0xb   : > { %p184_p7 = scmp.ge.s32.totalorder %s333_s9, 1  ;;  %p67_p8 = scmp.lt.s32.totalorder %s333_s9, 3 }
   0xc   : > { %s456_s17 = scalar_select %p389_p6, 1, 0 }
   0xd   : > { %p207_p9 = scmp.eq.s32.totalorder %s368_s10, 0  ;;  %p396_p10 = pnand %p184_p7, %p67_p8 }
   0xe   : > { %s335_s19 = smov [#allocation2]  }
   0xf   : > { %s80_s20 = sshll.u32 %s335_s19, 4  ;;  %p199_p11 = pneg %p396_p10  ;;  %s81_s20 = int_to_ptr.vmem [resolvable:$true] %s80_s20 }
  0x10   : > { %s254_s21 = scalar_lea.vmem %s81_s20, 128  ;;  %p262_p3 = scmp.lt.s32.totalorder %s81_s20, %s81_s20 }
  0x11   : > { %p200_p12 = pnand %p207_p9, %p199_p11  ;;  %p255_p0 = scmp.ne.s32.totalorder %s81_s20, %s254_s21 }
  0x12   : > { %p263_p4 = scmp.lt.s32.totalorder %s254_s21, %s254_s21 }
  0x13   : > { %p245_p13 = pneg %p200_p12 }
  0x14   : > { %p264_p6 = por %p263_p4, %p262_p3 }
  0x15   : > { %p257_p1 = pnand %p255_p0, %p245_p13 }
  0x17   : > { %p258_p2 = pneg %p257_p1 }
  0x19   : > { %p265_p7 = pnand %p264_p6, %p258_p2 }
  0x1b   : > { %268 = shalt.err (!%p265_p7)
}
  0x1c   : > { %202 = dma.hbm_to_vmem [thread:$0]  (!%p200_p12), %s453_s0, 128, %s81_s20, [#allocation3]  }
  0x1d   : > { %93 = sbr.rel (%p396_p10) target bundleno = 60 (0x3c), region = 24 }
  0x22   : > { %312 = dma.done.wait (%p207_p9), [#allocation3], 128  }
  0x23   : > { %314 = vsyncadd (%p207_p9), [#allocation3], 4294967168  ;;  %s105_s24 = sand.u32 1, %s325_s7   ;;  %s190_s28 = sshll.u32 %s368_s10, 7  ;;  %v108_v0 = vld [vmem:[#allocation2] sm:$0xff] }
  0x24   : > { %s188_s25 = sshll.u32 %s105_s24, 3  ;;  %s122_s2 = scalar_lea.hbm %s454_s1, %s190_s28 }
  0x25   : > { %s107_s26 = scalar_lea.vmem [#allocation5], %s188_s25  ;;  %s111_s3 = scalar_lea.sflag [#allocation4], %s105_s24 }
  0x26   : > { %s124_s27 = sshll.u32 %s107_s26, 4  ;;  %109 = vst [vmem:[%s107_s26] sm:$0xff] %v108_v0  ;;  %s336_s5 = smov [#allocation5]   ;;  %s415_s27 = int_to_ptr.vmem [resolvable:$true] %s124_s27 }
  0x27   : > { %s269_s4 = scalar_lea.vmem %s415_s27, 128  ;;  %s273_s11 = sshll.u32 %s336_s5, 4  ;;  %s274_s11 = int_to_ptr.vmem [resolvable:$false] %s273_s11 }
  0x28   : > { %p270_p6 = scmp.ne.s32.totalorder %s415_s27, %s269_s4  ;;  %s275_s10 = scalar_lea.vmem %s274_s11, 256 }
  0x29   : > { %p276_p10 = scmp.lt.s32.totalorder %s415_s27, %s274_s11  ;;  %p277_p11 = scmp.lt.s32.totalorder %s275_s10, %s269_s4 }
  0x2a   : > { %p271_p8 = pnand %p270_p6, %p385_p5 }
  0x2b   : > { %p278_p12 = por %p277_p11, %p276_p10 }
  0x2c   : > { %p272_p9 = pneg %p271_p8 }
  0x2e   : > { %p279_p13 = pnand %p278_p12, %p272_p9 }
  0x30   : > { %282 = shalt.err (!%p279_p13)
}
  0x31   : > { %s283_s13 = scalar_lea.hbm %s122_s2, 128  ;;  %s287_s19 = scalar_lea.hbm %s454_s1, 256 }
  0x32   : > { %p284_p0 = scmp.ne.s32.totalorder %s122_s2, %s283_s13  ;;  %p288_p3 = scmp.lt.s32.totalorder %s122_s2, %s454_s1 }
  0x33   : > { %p289_p4 = scmp.lt.s32.totalorder %s287_s19, %s283_s13 }
  0x34   : > { %p285_p1 = pnand %p284_p0, %p385_p5 }
  0x35   : > { %p290_p7 = por %p289_p4, %p288_p3 }
  0x36   : > { %p286_p2 = pneg %p285_p1 }
  0x38   : > { %p291_p6 = pnand %p290_p7, %p286_p2 }
  0x3a   : > { %294 = shalt.err (!%p291_p6)
}
  0x3b   : > { %197 = dma.vmem_to_hbm [thread:$0]  (%p385_p5), %s415_s27, 128, %s122_s2, %s111_s3  }
  0x3c PF: > { %p209_p8 = scmp.ge.s32.totalorder %s333_s9, 2  ;;  %s136_s22 = sand.u32 1, %s321_s6  }
  0x3d   : > { %p458_p9 = scmp.ne.s32.totalorder %s456_s17, 0  ;;  %s137_s23 = scalar_lea.sflag [#allocation4], %s136_s22 }
  0x3f   : > { %p204_p10 = pnand %p209_p8, %p458_p9 }
  0x41   : > { %p205_p11 = pneg %p204_p10 }
  0x43   : > { %316 = dma.done.wait (%p205_p11), %s137_s23, 128  }
  0x44   : > { %318 = vsyncadd (%p205_p11), %s137_s23, 4294967168  ;;  %p12_p12 = scmp.ge.s32.totalorder %s372_s12, 4   ;;  %s459_s6 = smov %s325_s7 }
  0x45   : > { %s460_s7 = smov %s329_s8  ;;  %s461_s8 = smov %s383_s15 }
  0x46   : > { %s462_s9 = smov %s372_s12  ;;  %14 = sbr.rel (!%p12_p12) target bundleno = 4 (0x4), region = 61 }
  0x4b   :  { %142 = vsyncpa [#allocation3], 1 }
  0x4c   :  { %144 = vsyncpa [#allocation3 + $0x1], 1 }
  0x4d   :  { %145 = vsyncpa [#allocation4], 1 }
  0x4e   :  { %147 = vsyncpa [#allocation4 + $0x1], 1 }

// kernel: _encode_jit.1
= control target key start
LH: loop header
LB: loop body
LE: loop exit
PB: predicated region body
PF: predicated region fallthrough
CT: control target
= control target key end

     0   :  { %v18_v0 = vlaneseq  ;;  %vm22_vm0 = vcmask 64512   ;;  %v476_v39 = vmov 0.0   ;;  %vm477_vm9 = vmmov 0   ;;  %s676_s0 = inlined_call_operand.vmem [shape: s32[8,8], index: 0, kind: input, shape index: {}]   ;;  %s677_s1 = inlined_call_operand.vmem [shape: f32[128,128], index: 1, kind: input, shape index: {}]   ;;  %s678_s2 = inlined_call_operand.vmem [shape: f32[128,128], index: 2, kind: input, shape index: {}]   ;;  %s679_s3 = inlined_call_operand.vmem [shape: f32[1,128], index: 3, kind: input, shape index: {}]   ;;  %s680_s4 = inlined_call_operand.vmem [shape: f32[8,128], index: 4, kind: output, shape index: {}]  }
   0x1   :  { %v17_v1 = vld [vmem:[%s676_s0] sm:$0xff]  ;;  %402 = vmatprep.subr.mxu0 %v476_v39  ;;  %437 = vmatprep.subr.mxu1 %v476_v39  ;;  %v188_v45 = vld [vmem:[%s677_s1 + $0x78] sm:$0xff]  ;;  %v187_v47 = vld [vmem:[%s677_s1 + $0x70] sm:$0xff] }
   0x2   :  { %v506_v2 = vand.u32 127, %v18_v0  ;;  %403 = vmatpush3.msra.mxu0 %v188_v45  ;;  %v186_v52 = vld [vmem:[%s677_s1 + $0x68] sm:$0xff]  ;;  %v185_v53 = vld [vmem:[%s677_s1 + $0x60] sm:$0xff]  ;;  %v184_v56 = vld [vmem:[%s677_s1 + $0x58] sm:$0xff]  ;;  %434 = vmatprep.mubr.msk.f32.mxu0 %vm477_vm9, %v476_v39 }
   0x3   :  { %404 = vmatprep.subr.mxu0 %v476_v39  ;;  %v183_v57 = vld [vmem:[%s677_s1 + $0x50] sm:$0xff]  ;;  %v182_v58 = vld [vmem:[%s677_s1 + $0x48] sm:$0xff]  ;;  %v181_v59 = vld [vmem:[%s677_s1 + $0x40] sm:$0xff]  ;;  %469 = vmatprep.mubr.msk.f32.mxu1 %vm477_vm9, %v476_v39 }
   0x4   :  { %vm20_vm1 = vcmp.eq.s32.totalorder %v506_v2, 0  ;;  %vm40_vm2 = vcmp.eq.s32.totalorder %v506_v2, 1  ;;  %vm59_vm3 = vcmp.eq.s32.totalorder %v506_v2, 2  ;;  %vm78_vm4 = vcmp.eq.s32.totalorder %v506_v2, 3  ;;  %405 = vmatpush3.msra.mxu0 %v187_v47  ;;  %v180_v60 = vld [vmem:[%s677_s1 + $0x38] sm:$0xff]  ;;  %v179_v61 = vld [vmem:[%s677_s1 + $0x30] sm:$0xff] }
   0x5   :  { %v21_v3 = vsel %vm20_vm1, %v17_v1, 0  ;;  %v41_v4 = vsel %vm40_vm2, %v17_v1, 0  ;;  %v60_v5 = vsel %vm59_vm3, %v17_v1, 0  ;;  %v79_v9 = vsel %vm78_vm4, %v17_v1, 0  ;;  %406 = vmatprep.subr.mxu0 %v476_v39  ;;  %v178_v62 = vld [vmem:[%s677_s1 + $0x28] sm:$0xff]  ;;  %v177_v63 = vld [vmem:[%s677_s1 + $0x20] sm:$0xff] }
   0x6   :  { %v23_v6 = vsel %vm22_vm0, %v21_v3, 0  ;;  %v42_v7 = vsel %vm22_vm0, %v41_v4, 0  ;;  %v61_v8 = vsel %vm22_vm0, %v60_v5, 0  ;;  %v80_v17 = vsel %vm22_vm0, %v79_v9, 0  ;;  %407 = vmatpush3.msra.mxu0 %v186_v52  ;;  %v176_v0 = vld [vmem:[%s677_s1 + $0x18] sm:$0xff]  ;;  %v174_v3 = vld [vmem:[%s677_s1 + $0x8] sm:$0xff] }
   0x7   :  { %v25_v10 = vshrl.u32 %v23_v6, 16  ;;  %v24_v11 = vand.u32 65535, %v23_v6  ;;  %v44_v12 = vshrl.u32 %v42_v7, 16  ;;  %v43_v13 = vand.u32 65535, %v42_v7  ;;  %408 = vmatprep.subr.mxu0 %v476_v39  ;;  %v173_v4 = vld [vmem:[%s677_s1] sm:$0xff]  ;;  %v275_v5 = vld [vmem:[%s678_s2 + $0x78] sm:$0xff] }
   0x8   :  { %v63_v16 = vshrl.u32 %v61_v8, 16  ;;  %v62_v20 = vand.u32 65535, %v61_v8  ;;  %vm97_vm5 = vcmp.eq.s32.totalorder %v506_v2, 4  ;;  %vm116_vm6 = vcmp.eq.s32.totalorder %v506_v2, 5  ;;  %409 = vmatpush3.msra.mxu0 %v185_v53  ;;  %v274_v6 = vld [vmem:[%s678_s2 + $0x70] sm:$0xff]  ;;  %438 = vmatpush3.msra.mxu1 %v275_v5  ;;  %v273_v7 = vld [vmem:[%s678_s2 + $0x68] sm:$0xff] }
   0x9   :  { %v27_v14 = vcvt.s32.f32 %v25_v10  ;;  %v26_v15 = vcvt.s32.f32 %v24_v11  ;;  %v46_v18 = vcvt.s32.f32 %v44_v12  ;;  %v45_v19 = vcvt.s32.f32 %v43_v13  ;;  %410 = vmatprep.subr.mxu0 %v476_v39  ;;  %439 = vmatprep.subr.mxu1 %v476_v39  ;;  %v272_v8 = vld [vmem:[%s678_s2 + $0x60] sm:$0xff]  ;;  %v271_v9 = vld [vmem:[%s678_s2 + $0x58] sm:$0xff]  ;;  %v270_v10 = vld [vmem:[%s678_s2 + $0x50] sm:$0xff] }
   0xa   :  { %v98_v21 = vsel %vm97_vm5, %v17_v1, 0  ;;  %v82_v22 = vshrl.u32 %v80_v17, 16  ;;  %v65_v23 = vcvt.s32.f32 %v63_v16  ;;  %v64_v24 = vcvt.s32.f32 %v62_v20  ;;  %411 = vmatpush3.msra.mxu0 %v184_v56  ;;  %440 = vmatpush3.msra.mxu1 %v274_v6  ;;  %v269_v11 = vld [vmem:[%s678_s2 + $0x48] sm:$0xff]  ;;  %v268_v12 = vld [vmem:[%s678_s2 + $0x40] sm:$0xff]  ;;  %v267_v13 = vld [vmem:[%s678_s2 + $0x38] sm:$0xff] }
   0xb   :  { %30 = vadd.xlane.f32.xlu0 %v27_v14  ;;  %28 = vadd.xlane.f32.xlu1 %v26_v15  ;;  %v81_v25 = vand.u32 65535, %v80_v17  ;;  %v99_v26 = vsel %vm22_vm0, %v98_v21, 0  ;;  %v117_v27 = vsel %vm116_vm6, %v17_v1, 0  ;;  %vm135_vm7 = vcmp.eq.s32.totalorder %v506_v2, 6  ;;  %v266_v14 = vld [vmem:[%s678_s2 + $0x30] sm:$0xff]  ;;  %v265_v15 = vld [vmem:[%s678_s2 + $0x28] sm:$0xff] }
   0xc   :  { %v84_v28 = vcvt.s32.f32 %v82_v22  ;;  %v101_v30 = vshrl.u32 %v99_v26, 16  ;;  %v100_v31 = vand.u32 65535, %v99_v26  ;;  %v118_v32 = vsel %vm22_vm0, %v117_v27, 0  ;;  %412 = vmatprep.subr.mxu0 %v476_v39  ;;  %441 = vmatprep.subr.mxu1 %v476_v39  ;;  %v264_v16 = vld [vmem:[%s678_s2 + $0x20] sm:$0xff]  ;;  %v263_v17 = vld [vmem:[%s678_s2 + $0x18] sm:$0xff] }
   0xd   :  { %v83_v29 = vcvt.s32.f32 %v81_v25  ;;  %v136_v33 = vsel %vm135_vm7, %v17_v1, 0  ;;  %v120_v34 = vshrl.u32 %v118_v32, 16  ;;  %vm154_vm8 = vcmp.eq.s32.totalorder %v506_v2, 7  ;;  %413 = vmatpush3.msra.mxu0 %v183_v57  ;;  %442 = vmatpush3.msra.mxu1 %v273_v7 }
   0xe   :  { %v103_v35 = vcvt.s32.f32 %v101_v30  ;;  %v102_v36 = vcvt.s32.f32 %v100_v31  ;;  %v119_v37 = vand.u32 65535, %v118_v32  ;;  %v137_v38 = vsel %vm22_vm0, %v136_v33, 0  ;;  %414 = vmatprep.subr.mxu0 %v476_v39  ;;  %443 = vmatprep.subr.mxu1 %v476_v39 }
   0xf   :  { %49 = vadd.xlane.f32.xlu0 %v46_v18  ;;  %47 = vadd.xlane.f32.xlu1 %v45_v19  ;;  %v155_v40 = vsel %vm154_vm8, %v17_v1, 0  ;;  %v122_v41 = vcvt.s32.f32 %v120_v34  ;;  %v139_v43 = vshrl.u32 %v137_v38, 16  ;;  %v138_v44 = vand.u32 65535, %v137_v38  ;;  %v175_v1 = vld [vmem:[%s677_s1 + $0x10] sm:$0xff] }
  0x10   :  { %v121_v42 = vcvt.s32.f32 %v119_v37  ;;  %v156_v46 = vsel %vm22_vm0, %v155_v40, 0  ;;  %415 = vmatpush3.msra.mxu0 %v182_v58  ;;  %444 = vmatpush3.msra.mxu1 %v272_v8  ;;  %v262_v18 = vld [vmem:[%s678_s2 + $0x10] sm:$0xff] }
  0x11   :  { %v141_v48 = vcvt.s32.f32 %v139_v43  ;;  %v140_v49 = vcvt.s32.f32 %v138_v44  ;;  %v158_v50 = vshrl.u32 %v156_v46, 16  ;;  %v157_v51 = vand.u32 65535, %v156_v46  ;;  %416 = vmatprep.subr.mxu0 %v476_v39  ;;  %445 = vmatprep.subr.mxu1 %v476_v39 }
  0x12   :  { %417 = vmatpush3.msra.mxu0 %v181_v59  ;;  %446 = vmatpush3.msra.mxu1 %v271_v9 }
  0x13   :  { %68 = vadd.xlane.f32.xlu0 %v65_v23  ;;  %66 = vadd.xlane.f32.xlu1 %v64_v24  ;;  %v160_v54 = vcvt.s32.f32 %v158_v50  ;;  %v159_v55 = vcvt.s32.f32 %v157_v51 }
  0x14   :  { %418 = vmatprep.subr.mxu0 %v476_v39  ;;  %447 = vmatprep.subr.mxu1 %v476_v39 }
  0x15   :  { %419 = vmatpush3.msra.mxu0 %v180_v60  ;;  %448 = vmatpush3.msra.mxu1 %v270_v10 }
  0x16   :  { %420 = vmatprep.subr.mxu0 %v476_v39  ;;  %449 = vmatprep.subr.mxu1 %v476_v39 }
  0x17   :  { %87 = vadd.xlane.f32.xlu0 %v84_v28  ;;  %85 = vadd.xlane.f32.xlu1 %v83_v29 }
  0x18   :  { %421 = vmatpush3.msra.mxu0 %v179_v61  ;;  %450 = vmatpush3.msra.mxu1 %v269_v11 }
  0x19   :  { %422 = vmatprep.subr.mxu0 %v476_v39  ;;  %451 = vmatprep.subr.mxu1 %v476_v39 }
  0x1a   :  { %423 = vmatpush3.msra.mxu0 %v178_v62  ;;  %452 = vmatpush3.msra.mxu1 %v268_v12 }
  0x1b   :  { %106 = vadd.xlane.f32.xlu0 %v103_v35  ;;  %104 = vadd.xlane.f32.xlu1 %v102_v36 }
  0x1c   :  { %424 = vmatprep.subr.mxu0 %v476_v39  ;;  %453 = vmatprep.subr.mxu1 %v476_v39 }
  0x1d   :  { %425 = vmatpush3.msra.mxu0 %v177_v63  ;;  %454 = vmatpush3.msra.mxu1 %v267_v13 }
  0x1e   :  { %426 = vmatprep.subr.mxu0 %v476_v39  ;;  %455 = vmatprep.subr.mxu1 %v476_v39 }
  0x1f   :  { %125 = vadd.xlane.f32.xlu0 %v122_v41  ;;  %123 = vadd.xlane.f32.xlu1 %v121_v42 }
  0x20   :  { %427 = vmatpush3.msra.mxu0 %v176_v0  ;;  %456 = vmatpush3.msra.mxu1 %v266_v14 }
  0x21   :  { %428 = vmatprep.subr.mxu0 %v476_v39  ;;  %457 = vmatprep.subr.mxu1 %v476_v39 }
  0x22   :  { %429 = vmatpush3.msra.mxu0 %v175_v1  ;;  %458 = vmatpush3.msra.mxu1 %v265_v15 }
  0x23   :  { %144 = vadd.xlane.f32.xlu0 %v141_v48  ;;  %142 = vadd.xlane.f32.xlu1 %v140_v49 }
  0x24   :  { %430 = vmatprep.subr.mxu0 %v476_v39  ;;  %459 = vmatprep.subr.mxu1 %v476_v39 }
  0x25   :  { %431 = vmatpush3.msra.mxu0 %v174_v3  ;;  %460 = vmatpush3.msra.mxu1 %v264_v16 }
  0x26   :  { %432 = vmatprep.subr.mxu0 %v476_v39  ;;  %461 = vmatprep.subr.mxu1 %v476_v39 }
  0x27   :  { %163 = vadd.xlane.f32.xlu0 %v160_v54  ;;  %161 = vadd.xlane.f32.xlu1 %v159_v55 }
  0x28   :  { %433 = vmatpush3.msra.mxu0 %v173_v4  ;;  %462 = vmatpush3.msra.mxu1 %v263_v17 }
  0x29   :  { %463 = vmatprep.subr.mxu1 %v476_v39 }
  0x2a   :  { %464 = vmatpush3.msra.mxu1 %v262_v18 }
  0x2b   :  { %465 = vmatprep.subr.mxu1 %v476_v39 }
  0x94   :  { %v31_v19 = vpop.xlane.xlu0 %30  ;;  %v29_v20 = vpop.xlane.xlu1 %28 }
  0x95   :  { %v33_v24 = vcvt.f32.s32 %v31_v19  ;;  %v32_v31 = vcvt.f32.s32 %v29_v20  ;;  %v261_v20 = vld [vmem:[%s678_s2 + $0x8] sm:$0xff] }
  0x96   :  { %466 = vmatpush3.msra.mxu1 %v261_v20 }
  0x97   :  { %v34_v30 = vshll.u32 %v33_v24, 16  ;;  %467 = vmatprep.subr.mxu1 %v476_v39  ;;  %v367_v24 = vld [vmem:[%s679_s3] ss:$0 sm:$0xff] }
  0x98   :  { %v50_v21 = vpop.xlane.xlu0 %49  ;;  %v48_v22 = vpop.xlane.xlu1 %47 }
  0x99   :  { %v52_v23 = vcvt.f32.s32 %v50_v21  ;;  %v51_v28 = vcvt.f32.s32 %v48_v22  ;;  %v35_v41 = vadd.s32 %v34_v30, %v32_v31  ;;  %v260_v21 = vld [vmem:[%s678_s2] sm:$0xff] }
  0x9a   :  { %468 = vmatpush3.msra.mxu1 %v260_v21 }
  0x9b   :  { %v53_v27 = vshll.u32 %v52_v23, 16  ;;  %vm36_vm11 = vcmp.eq.s32.totalorder %v506_v2, %v35_v41 }
  0x9c   :  { %v69_v25 = vpop.xlane.xlu0 %68  ;;  %v67_v26 = vpop.xlane.xlu1 %66  ;;  %v359_v55 = vsel %vm36_vm11, 1.0, %v476_v39 }
  0x9d   :  { %v71_v29 = vcvt.f32.s32 %v69_v25  ;;  %v54_v34 = vadd.s32 %v53_v27, %v51_v28  ;;  %v70_v36 = vcvt.f32.s32 %v67_v26 }
  0x9f   :  { %v72_v35 = vshll.u32 %v71_v29, 16  ;;  %vm55_vm10 = vcmp.eq.s32.totalorder %v506_v2, %v54_v34 }
  0xa0   :  { %v88_v32 = vpop.xlane.xlu0 %87  ;;  %v86_v33 = vpop.xlane.xlu1 %85  ;;  %v360_v49 = vsel %vm55_vm10, 1.0, %v476_v39 }
  0xa1   :  { %v90_v37 = vcvt.f32.s32 %v88_v32  ;;  %v89_v40 = vcvt.f32.s32 %v86_v33  ;;  %v73_v44 = vadd.s32 %v72_v35, %v70_v36  ;;  %v58_v57 = vadd.f32 %v360_v49, %v359_v55 }
  0xa3   :  { %v91_v38 = vshll.u32 %v90_v37, 16  ;;  %vm74_vm12 = vcmp.eq.s32.totalorder %v506_v2, %v73_v44 }
  0xa4   :  { %v107_v42 = vpop.xlane.xlu0 %106  ;;  %v105_v43 = vpop.xlane.xlu1 %104  ;;  %v361_v58 = vsel %vm74_vm12, 1.0, %v476_v39 }
  0xa5   :  { %v109_v45 = vcvt.f32.s32 %v107_v42  ;;  %v108_v46 = vcvt.f32.s32 %v105_v43  ;;  %v92_v47 = vadd.s32 %v91_v38, %v89_v40  ;;  %v77_v1 = vadd.f32 %v361_v58, %v58_v57 }
  0xa7   :  { %v110_v48 = vshll.u32 %v109_v45, 16  ;;  %vm93_vm13 = vcmp.eq.s32.totalorder %v506_v2, %v92_v47 }
  0xa8   :  { %v126_v50 = vpop.xlane.xlu0 %125  ;;  %v124_v51 = vpop.xlane.xlu1 %123  ;;  %v362_v0 = vsel %vm93_vm13, 1.0, %v476_v39 }
  0xa9   :  { %v111_v52 = vadd.s32 %v110_v48, %v108_v46  ;;  %v128_v53 = vcvt.f32.s32 %v126_v50  ;;  %v127_v54 = vcvt.f32.s32 %v124_v51  ;;  %v96_v7 = vadd.f32 %v362_v0, %v77_v1 }
  0xab   :  { %v129_v56 = vshll.u32 %v128_v53, 16  ;;  %vm112_vm14 = vcmp.eq.s32.totalorder %v506_v2, %v111_v52 }
  0xac   :  { %v145_v59 = vpop.xlane.xlu0 %144  ;;  %v143_v60 = vpop.xlane.xlu1 %142  ;;  %v363_v4 = vsel %vm112_vm14, 1.0, %v476_v39 }
  0xad   :  { %v130_v61 = vadd.s32 %v129_v56, %v127_v54  ;;  %v147_v62 = vcvt.f32.s32 %v145_v59  ;;  %v146_v63 = vcvt.f32.s32 %v143_v60  ;;  %v115_v12 = vadd.f32 %v363_v4, %v96_v7 }
  0xaf   :  { %vm131_vm15 = vcmp.eq.s32.totalorder %v506_v2, %v130_v61  ;;  %v148_v3 = vshll.u32 %v147_v62, 16 }
  0xb0   :  { %v164_v5 = vpop.xlane.xlu0 %163  ;;  %v162_v6 = vpop.xlane.xlu1 %161  ;;  %v364_v11 = vsel %vm131_vm15, 1.0, %v476_v39 }
  0xb1   :  { %v149_v8 = vadd.s32 %v148_v3, %v146_v63  ;;  %v166_v9 = vcvt.f32.s32 %v164_v5  ;;  %v165_v10 = vcvt.f32.s32 %v162_v6  ;;  %v134_v15 = vadd.f32 %v364_v11, %v115_v12 }
  0xb3   :  { %vm150_vm0 = vcmp.eq.s32.totalorder %v506_v2, %v149_v8  ;;  %v167_v13 = vshll.u32 %v166_v9, 16 }
  0xb4   :  { %v365_v14 = vsel %vm150_vm0, 1.0, %v476_v39 }
  0xb5   :  { %v168_v16 = vadd.s32 %v167_v13, %v165_v10  ;;  %v153_v17 = vadd.f32 %v365_v14, %v134_v15 }
  0xb7   :  { %vm169_vm1 = vcmp.eq.s32.totalorder %v506_v2, %v168_v16 }
  0xb8   :  { %v366_v18 = vsel %vm169_vm1, 1.0, %v476_v39 }
  0xb9   :  { %v172_v19 = vadd.f32 %v366_v18, %v153_v17 }
  0xbb   :  { %435 = vmatmul.mubr.f32.vlgmr.msra.gmra.mxu0 %v172_v19 }
 0x17b   :  { %v255_v22 = vpop.f32.mrf.mxu0 }
 0x17c   :  { %v259_v23 = vmul.f32 0.125, %v255_v22 }
 0x17d   :  { %v436_v2 = vpop.f32.mrf.mxu0 }
 0x17e   :  { %470 = vmatmul.mubr.f32.vlgmr.msra.gmra.mxu1 %v259_v23 }
 0x23e   :  { %v349_v25 = vpop.f32.mrf.mxu1 }
 0x23f   :  { %v350_v26 = vadd.f32 %v367_v24, %v349_v25 }
 0x240   :  { %v471_v27 = vpop.f32.mrf.mxu1 }
 0x241   :  { %474 = vtanh.f32 %v350_v26 }
 0x24e   :  { %v475_v28 = vpop.eup %474 }
 0x24f   :  { %354 = vst [vmem:[%s680_s4] sm:$0xff] %v475_v28 }

</bundles_post_ra>
